<compile_context>
chip_gen: v7x
topology: tpu7x:2x2x1
jax: 0.10.0
libtpu: 0.0.40
codegen_flags: <defaults>
</compile_context>

<pallas_src>
import jax
import jax.numpy as jnp
from jax.experimental import pallas as pl
from jax.experimental.pallas import tpu as pltpu

NEG_SLOPE = 0.01  # torch.nn.LeakyReLU default


def _leaky_relu(x):
    return jnp.where(x > 0, x, NEG_SLOPE * x)


def _make_kernel(n_layers):
    """MLP kernel: n_layers Linear layers, LeakyReLU between them, sigmoid at the end."""

    def kernel(*refs):
        x_ref, o_ref = refs[0], refs[-1]
        wb = refs[1:-1]                           # w0, b0, w1, b1, ..., w_{n-1}, b_{n-1}
        # In-kernel downcast: x arrives as f32, cheap VPU cast hidden under the MXU.
        h = x_ref[...].astype(jnp.bfloat16)
        for l in range(n_layers - 1):
            w_ref, b_ref = wb[2 * l], wb[2 * l + 1]
            z = jnp.dot(h, w_ref[...], preferred_element_type=jnp.float32)
            z = _leaky_relu(z + b_ref[...])       # f32 elementwise (v5e-safe)
            h = z.astype(jnp.bfloat16)            # bf16 only on the way into the MXU
        w_ref, b_ref = wb[-2], wb[-1]             # final Linear(h,1) as a staircase matmul
        y = jnp.dot(h, w_ref[...], preferred_element_type=jnp.float32) + b_ref[0, 0]
        o_ref[...] = 1.0 / (1.0 + jnp.exp(-y))    # exact sigmoid (tiny (bb, P) slab)

    return kernel


def _block_diag(w, p):
    """(din, dout) -> block-diagonal (p*din, p*dout): p copies of w on the diagonal."""
    if p == 1:
        return w
    din, dout = w.shape
    eye = jnp.eye(p, dtype=w.dtype)
    return (eye[:, None, :, None] * w[None, :, None, :]).reshape(p * din, p * dout)


def _choose_pack(batch, feat_dims):
    """Largest P in {8,4,2} such that P | batch, the packed lane width fits in 128
    lanes, and there are at least 8 packed rows; otherwise 1 (un-packed fallback)."""
    max_feat = max(feat_dims)
    for p in (8, 4, 2):
        if batch % p == 0 and p * max_feat <= 128 and batch // p >= 8:
            return p
    return 1


def mine_forward(x, params, *, block_rows=4096):
    """x: (B, input_dim) float32.  params: list of (w, b), w: (din, dout), b: (dout,)."""
    B, in_dim = x.shape
    n_layers = len(params)
    feat_dims = [in_dim] + [w.shape[1] for (w, _) in params[:-1]]
    P = _choose_pack(B, feat_dims)

    Bpk = B // P                                    # packed rows (P samples per row)
    bb = block_rows if Bpk > block_rows else Bpk    # batch tile, in packed rows
    num_tiles = pl.cdiv(Bpk, bb)                    # ragged last tile: Pallas drops OOB writes

    const = lambda i: (0, 0)
    # Free layout-preserving view: sample k -> row k//P, lanes (k%P)*in_dim .. +in_dim.
    inputs = [x.reshape(Bpk, P * in_dim)]
    in_specs = [pl.BlockSpec((bb, P * in_dim), lambda i: (i, 0))]

    # NOTE: this packing is a pure function of params; hoist it out of the hot path
    # (precompute once) if mine_forward is called inside a training loop.
    w_bytes = 0
    for l, (w, b) in enumerate(params):
        wp = _block_diag(w.astype(jnp.float32), P).astype(jnp.bfloat16)
        inputs.append(wp)
        in_specs.append(pl.BlockSpec(wp.shape, const))
        w_bytes += wp.size * 2
        if l < n_layers - 1:
            bp = jnp.tile(b.reshape(1, -1).astype(jnp.float32), (1, P))
            inputs.append(bp)
            in_specs.append(pl.BlockSpec(bp.shape, const))
            w_bytes += bp.size * 4
        else:
            bp = b.reshape(1, 1).astype(jnp.float32)          # scalar bias -> SMEM
            inputs.append(bp)
            in_specs.append(pl.BlockSpec((1, 1), const,
                                         memory_space=pltpu.MemorySpace.SMEM))
            w_bytes += 4

    flops = 0
    d_prev = P * in_dim
    for (w, _) in params:
        d_out = P * w.shape[1]
        flops += 2 * Bpk * d_prev * d_out
        d_prev = d_out
    bytes_accessed = x.size * 4 + Bpk * P * 4 + w_bytes

    out = pl.pallas_call(
        _make_kernel(n_layers),
        out_shape=jax.ShapeDtypeStruct((Bpk, P), jnp.float32),
        grid_spec=pltpu.PrefetchScalarGridSpec(
            num_scalar_prefetch=0,
            grid=(num_tiles,),
            in_specs=in_specs,
            out_specs=pl.BlockSpec((bb, P), lambda i: (i, 0)),
        ),
        compiler_params=pltpu.CompilerParams(
            # TODO(synk): on v7x, switch to pltpu.CORE_PARALLEL if "parallel" does not
            # shard the 1-D batch grid across the two TensorCores.
            dimension_semantics=("parallel",),
            vmem_limit_bytes=32 * 1024 * 1024,
        ),
        cost_estimate=pl.CostEstimate(
            flops=flops, transcendentals=Bpk * P, bytes_accessed=bytes_accessed),
    )(*inputs)

    # (Bpk, P) row-major == (B, 1): element (r, j) is sample r*P + j.
    return out.reshape(B, 1)


def init_params(key, input_dim, hidden_dim):
    """Deterministic torch-style init; weights stored (in_features, out_features)."""
    dims = [input_dim] + list(hidden_dim) + [1]
    params = []
    for din, dout in zip(dims[:-1], dims[1:]):
        key, kw, kb = jax.random.split(key, 3)
        bound = 1.0 / float(din) ** 0.5
        w = jax.random.uniform(kw, (din, dout), jnp.float32, -bound, bound)
        b = jax.random.uniform(kb, (dout,), jnp.float32, -bound, bound)
        params.append((w, b))
    return params


def reference_forward_f32(x, params):
    """Plain-JAX f32 reference (PyTorch semantics)."""
    h = x
    for i, (w, b) in enumerate(params):
        h = h @ w + b.reshape(1, -1)
        if i < len(params) - 1:
            h = _leaky_relu(h)
    return jax.nn.sigmoid(h)


def reference_forward_bf16(x, params):
    """Plain-JAX reference matching the kernel's bf16-operand / f32-accumulate math."""
    bf = jnp.bfloat16
    h = x.astype(bf)
    for i, (w, b) in enumerate(params):
        z = jnp.dot(h, w.astype(bf), preferred_element_type=jnp.float32) + b.reshape(1, -1)
        if i < len(params) - 1:
            h = _leaky_relu(z).astype(bf)
        else:
            h = z
    return jax.nn.sigmoid(h)


if __name__ == "__main__":
    input_dim = 32
    hidden_dim = [32, 32]

    key = jax.random.PRNGKey(0)
    key, kx1, kx2, kx3 = jax.random.split(key, 4)
    params = init_params(key, input_dim, hidden_dim)

    # Case 1: small batch (un-packed fallback, single tile).
    x_small = jax.random.normal(kx1, (8, input_dim), jnp.float32)
    out_small = jax.block_until_ready(mine_forward(x_small, params))
    assert out_small.shape == (8, 1), out_small.shape
    assert jnp.allclose(out_small, reference_forward_bf16(x_small, params),
                        atol=2e-3), "small-batch mismatch vs bf16-matched reference"
    assert jnp.allclose(out_small, reference_forward_f32(x_small, params),
                        atol=3e-2), "small-batch mismatch vs f32 reference"

    # Case 2: 4-sample lane packing + multi-step pipelined grid with a ragged last tile
    # (300 samples -> 75 packed rows of 128 lanes; block_rows=16 -> 5 tiles, last partial).
    x_big = jax.random.normal(kx2, (300, input_dim), jnp.float32)
    out_big = jax.block_until_ready(mine_forward(x_big, params, block_rows=16))
    assert out_big.shape == (300, 1), out_big.shape
    assert jnp.allclose(out_big, reference_forward_bf16(x_big, params),
                        atol=2e-3), "packed-batch mismatch vs bf16-matched reference"
    assert jnp.allclose(out_big, reference_forward_f32(x_big, params),
                        atol=3e-2), "packed-batch mismatch vs f32 reference"

    # Case 3: odd batch exercises the P=1 fallback path.
    x_odd = jax.random.normal(kx3, (37, input_dim), jnp.float32)
    out_odd = jax.block_until_ready(mine_forward(x_odd, params))
    assert out_odd.shape == (37, 1), out_odd.shape
    assert jnp.allclose(out_odd, reference_forward_bf16(x_odd, params),
                        atol=2e-3), "odd-batch mismatch vs bf16-matched reference"

    print("KERNEL_OK")
</pallas_src>

<mosaic_0001>
module attributes {stable_mosaic.version = 11 : i64} {
  func.func @kernel(%arg0: i32, %arg1: memref<8x32xf32, #tpu.memory_space<vmem>>, %arg2: memref<32x32xbf16, #tpu.memory_space<vmem>>, %arg3: memref<1x32xf32, #tpu.memory_space<vmem>>, %arg4: memref<32x32xbf16, #tpu.memory_space<vmem>>, %arg5: memref<1x32xf32, #tpu.memory_space<vmem>>, %arg6: memref<32x1xbf16, #tpu.memory_space<vmem>>, %arg7: memref<1x1xf32, #tpu.memory_space<smem>>, %arg8: memref<8x1xf32, #tpu.memory_space<vmem>>) attributes {dimension_semantics = [#tpu.dimension_semantics<parallel>], iteration_bounds = array<i64: 1>, scalar_prefetch = 0 : i64, scratch_operands = 0 : i64, tpu.core_type = #tpu.core_type<tc>, window_params = [{transform_indices = @transform_0, window_bounds = array<i64: 8, 32>}, {pipeline_mode = #tpu.pipeline_mode<synchronous>, transform_indices = @transform_1, window_bounds = array<i64: 32, 32>}, {pipeline_mode = #tpu.pipeline_mode<synchronous>, transform_indices = @transform_2, window_bounds = array<i64: 1, 32>}, {pipeline_mode = #tpu.pipeline_mode<synchronous>, transform_indices = @transform_3, window_bounds = array<i64: 32, 32>}, {pipeline_mode = #tpu.pipeline_mode<synchronous>, transform_indices = @transform_4, window_bounds = array<i64: 1, 32>}, {pipeline_mode = #tpu.pipeline_mode<synchronous>, transform_indices = @transform_5, window_bounds = array<i64: 32, 1>}, {transform_indices = @transform_6, window_bounds = array<i64: 1, 1>}, {transform_indices = @transform_7, window_bounds = array<i64: 8, 1>}]} {
    %c0 = arith.constant 0 : index
    %c0_0 = arith.constant 0 : index
    %0 = vector.load %arg1[%c0, %c0_0] : memref<8x32xf32, #tpu.memory_space<vmem>>, vector<8x32xf32>
    %1 = arith.truncf %0 : vector<8x32xf32> to vector<8x32xbf16>
    %c0_1 = arith.constant 0 : index
    %c0_2 = arith.constant 0 : index
    %2 = vector.load %arg2[%c0_1, %c0_2] : memref<32x32xbf16, #tpu.memory_space<vmem>>, vector<32x32xbf16>
    %cst = arith.constant dense<0.000000e+00> : vector<8x32xf32>
    %3 = tpu.matmul %1, %2, %cst {dimension_numbers = #tpu.dot_dimension_numbers<[1], [0], [0], [1], [0, 0, 1, 1], [], []>} : vector<8x32xbf16>, vector<32x32xbf16>, vector<8x32xf32> -> vector<8x32xf32>
    %c0_3 = arith.constant 0 : index
    %c0_4 = arith.constant 0 : index
    %4 = vector.load %arg3[%c0_3, %c0_4] : memref<1x32xf32, #tpu.memory_space<vmem>>, vector<1x32xf32>
    %5 = vector.broadcast %4 : vector<1x32xf32> to vector<8x32xf32>
    %6 = arith.addf %3, %5 : vector<8x32xf32>
    %cst_5 = arith.constant 0.000000e+00 : f32
    %7 = vector.broadcast %cst_5 : f32 to vector<8x32xf32>
    %8 = arith.cmpf ogt, %6, %7 : vector<8x32xf32>
    %cst_6 = arith.constant 0.00999999977 : f32
    %9 = vector.broadcast %cst_6 : f32 to vector<8x32xf32>
    %10 = arith.mulf %9, %6 : vector<8x32xf32>
    %11 = arith.select %8, %6, %10 : vector<8x32xi1>, vector<8x32xf32>
    %12 = arith.truncf %11 : vector<8x32xf32> to vector<8x32xbf16>
    %c0_7 = arith.constant 0 : index
    %c0_8 = arith.constant 0 : index
    %13 = vector.load %arg4[%c0_7, %c0_8] : memref<32x32xbf16, #tpu.memory_space<vmem>>, vector<32x32xbf16>
    %cst_9 = arith.constant dense<0.000000e+00> : vector<8x32xf32>
    %14 = tpu.matmul %12, %13, %cst_9 {dimension_numbers = #tpu.dot_dimension_numbers<[1], [0], [0], [1], [0, 0, 1, 1], [], []>} : vector<8x32xbf16>, vector<32x32xbf16>, vector<8x32xf32> -> vector<8x32xf32>
    %c0_10 = arith.constant 0 : index
    %c0_11 = arith.constant 0 : index
    %15 = vector.load %arg5[%c0_10, %c0_11] : memref<1x32xf32, #tpu.memory_space<vmem>>, vector<1x32xf32>
    %16 = vector.broadcast %15 : vector<1x32xf32> to vector<8x32xf32>
    %17 = arith.addf %14, %16 : vector<8x32xf32>
    %cst_12 = arith.constant 0.000000e+00 : f32
    %18 = vector.broadcast %cst_12 : f32 to vector<8x32xf32>
    %19 = arith.cmpf ogt, %17, %18 : vector<8x32xf32>
    %cst_13 = arith.constant 0.00999999977 : f32
    %20 = vector.broadcast %cst_13 : f32 to vector<8x32xf32>
    %21 = arith.mulf %20, %17 : vector<8x32xf32>
    %22 = arith.select %19, %17, %21 : vector<8x32xi1>, vector<8x32xf32>
    %23 = arith.truncf %22 : vector<8x32xf32> to vector<8x32xbf16>
    %c0_14 = arith.constant 0 : index
    %c0_15 = arith.constant 0 : index
    %24 = vector.load %arg6[%c0_14, %c0_15] : memref<32x1xbf16, #tpu.memory_space<vmem>>, vector<32x1xbf16>
    %cst_16 = arith.constant dense<0.000000e+00> : vector<8x1xf32>
    %25 = tpu.matmul %23, %24, %cst_16 {dimension_numbers = #tpu.dot_dimension_numbers<[1], [0], [0], [1], [0, 0, 1, 1], [], []>} : vector<8x32xbf16>, vector<32x1xbf16>, vector<8x1xf32> -> vector<8x1xf32>
    %c0_17 = arith.constant 0 : index
    %c0_18 = arith.constant 0 : index
    %26 = memref.load %arg7[%c0_17, %c0_18] : memref<1x1xf32, #tpu.memory_space<smem>>
    %27 = vector.broadcast %26 : f32 to vector<8x1xf32>
    %28 = arith.addf %25, %27 : vector<8x1xf32>
    %cst_19 = arith.constant 0.000000e+00 : f32
    %29 = vector.broadcast %cst_19 : f32 to vector<8x1xf32>
    %30 = arith.subf %29, %28 : vector<8x1xf32>
    %31 = math.exp %30 : vector<8x1xf32>
    %cst_20 = arith.constant 1.000000e+00 : f32
    %32 = vector.broadcast %cst_20 : f32 to vector<8x1xf32>
    %33 = arith.addf %32, %31 : vector<8x1xf32>
    %cst_21 = arith.constant 1.000000e+00 : f32
    %34 = vector.broadcast %cst_21 : f32 to vector<8x1xf32>
    %35 = arith.divf %34, %33 : vector<8x1xf32>
    %c0_22 = arith.constant 0 : index
    %c0_23 = arith.constant 0 : index
    %36 = vector.load %arg8[%c0_22, %c0_23] : memref<8x1xf32, #tpu.memory_space<vmem>>, vector<8x1xf32>
    tpu.vector_store %arg8[%c0_22, %c0_23], %35 {strides = array<i32>} : memref<8x1xf32, #tpu.memory_space<vmem>>, vector<8x1xf32>,
    return
  }
  func.func @transform_0(%arg0: i32) -> (i32, i32) {
    %c0_i32 = arith.constant 0 : i32
    %c0_i32_0 = arith.constant 0 : i32
    return %arg0, %c0_i32 : i32, i32
  }
  func.func @transform_1(%arg0: i32) -> (i32, i32) {
    %c0_i32 = arith.constant 0 : i32
    %c0_i32_0 = arith.constant 0 : i32
    %c0_i32_1 = arith.constant 0 : i32
    return %c0_i32, %c0_i32_0 : i32, i32
  }
  func.func @transform_2(%arg0: i32) -> (i32, i32) {
    %c0_i32 = arith.constant 0 : i32
    %c0_i32_0 = arith.constant 0 : i32
    %c0_i32_1 = arith.constant 0 : i32
    return %c0_i32, %c0_i32_0 : i32, i32
  }
  func.func @transform_3(%arg0: i32) -> (i32, i32) {
    %c0_i32 = arith.constant 0 : i32
    %c0_i32_0 = arith.constant 0 : i32
    %c0_i32_1 = arith.constant 0 : i32
    return %c0_i32, %c0_i32_0 : i32, i32
  }
  func.func @transform_4(%arg0: i32) -> (i32, i32) {
    %c0_i32 = arith.constant 0 : i32
    %c0_i32_0 = arith.constant 0 : i32
    %c0_i32_1 = arith.constant 0 : i32
    return %c0_i32, %c0_i32_0 : i32, i32
  }
  func.func @transform_5(%arg0: i32) -> (i32, i32) {
    %c0_i32 = arith.constant 0 : i32
    %c0_i32_0 = arith.constant 0 : i32
    %c0_i32_1 = arith.constant 0 : i32
    return %c0_i32, %c0_i32_0 : i32, i32
  }
  func.func @transform_6(%arg0: i32) -> (i32, i32) {
    %c0_i32 = arith.constant 0 : i32
    %c0_i32_0 = arith.constant 0 : i32
    %c0_i32_1 = arith.constant 0 : i32
    return %c0_i32, %c0_i32_0 : i32, i32
  }
  func.func @transform_7(%arg0: i32) -> (i32, i32) {
    %c0_i32 = arith.constant 0 : i32
    %c0_i32_0 = arith.constant 0 : i32
    return %arg0, %c0_i32 : i32, i32
  }
}

</mosaic_0001>

<bundles_post_ra>
// kernel: tpu_custom_call.1
= control target key start
LH: loop header
LB: loop body
LE: loop exit
PB: predicated region body
PF: predicated region fallthrough
CT: control target
= control target key end

     0   :  { %13 = vsyncpa [#allocation4], 0  ;;  %s474_s0 = inlined_call_operand.hbm [shape: f32[8,32], index: 0, kind: input, shape index: {}]   ;;  %s475_s1 = inlined_call_operand.vmem [shape: bf16[32,32], index: 1, kind: input, shape index: {}]   ;;  %s476_s2 = inlined_call_operand.hbm [shape: f32[1,32], index: 2, kind: input, shape index: {}]   ;;  %s477_s3 = inlined_call_operand.vmem [shape: bf16[32,32], index: 3, kind: input, shape index: {}]   ;;  %s478_s4 = inlined_call_operand.vmem [shape: f32[1,32], index: 4, kind: input, shape index: {}]   ;;  %s479_s5 = inlined_call_operand.vmem [shape: bf16[32,1], index: 5, kind: input, shape index: {}]   ;;  %s480_s6 = inlined_call_operand.<no memory space> [shape: f32[1,1], index: 6, kind: input, shape index: {}]   ;;  %s481_s7 = inlined_call_operand.vmem [shape: f32[8,1], index: 7, kind: output, shape index: {}]  }
   0x1   :  { %14 = vsyncpa [#allocation6], 0  ;;  %s376_s24 = smov [#allocation3]   ;;  %s377_s26 = smov [#allocation5]  }
   0x2   :  { %s21_s25 = sshll.u32 %s376_s24, 4  ;;  %s33_s27 = sshll.u32 %s377_s26, 4  ;;  %s22_s25 = int_to_ptr.vmem [resolvable:$true] %s21_s25  ;;  %s34_s27 = int_to_ptr.vmem [resolvable:$true] %s33_s27 }
   0x3   :  { %s328_s30 = scalar_lea.hbm %s474_s0, 128 }
   0x4   :  { %p329_p0 = scmp.ne.s32.totalorder %s474_s0, %s328_s30  ;;  %p332_p1 = scmp.lt.u32.totalorder %s328_s30, %s474_s0 }
   0x6   :  { %p334_p2 = pnand %p332_p1, %p329_p0 }
   0x8   :  { %337 = shalt.err (!%p334_p2)
}
   0x9   :  { %s338_s12 = scalar_lea.vmem %s22_s25, 128  ;;  %p343_p4 = scmp.lt.s32.totalorder %s22_s25, %s22_s25 }
   0xa   :  { %p339_p3 = scmp.ne.s32.totalorder %s22_s25, %s338_s12  ;;  %p344_p5 = scmp.lt.s32.totalorder %s338_s12, %s338_s12 }
   0xc   :  { %p345_p6 = por %p344_p5, %p343_p4 }
   0xe   :  { %p346_p7 = pnand %p345_p6, %p339_p3 }
  0x10   :  { %349 = shalt.err (!%p346_p7)
}
  0x11   :  { %24 = dma.hbm_to_vmem [thread:$0]  %s474_s0, 128, %s22_s25, [#allocation4]  }
  0x12   :  { %s350_s17 = scalar_lea.hbm %s476_s2, 16 }
  0x13   :  { %p351_p8 = scmp.ne.s32.totalorder %s476_s2, %s350_s17  ;;  %p354_p9 = scmp.lt.u32.totalorder %s350_s17, %s476_s2 }
  0x15   :  { %p356_p10 = pnand %p354_p9, %p351_p8 }
  0x17   :  { %359 = shalt.err (!%p356_p10)
}
  0x18   :  { %s360_s22 = scalar_lea.vmem %s34_s27, 16  ;;  %s364_s23 = scalar_lea.vmem %s34_s27, 32 }
  0x19   :  { %p361_p11 = scmp.ne.s32.totalorder %s34_s27, %s360_s22  ;;  %p365_p12 = scmp.lt.s32.totalorder %s34_s27, %s34_s27 }
  0x1a   :  { %p366_p13 = scmp.lt.s32.totalorder %s364_s23, %s360_s22 }
  0x1c   :  { %p367_p0 = por %p366_p13, %p365_p12 }
  0x1e   :  { %p368_p1 = pnand %p367_p0, %p361_p11 }
  0x20   :  { %371 = shalt.err (!%p368_p1)
}
  0x21   :  { %36 = dma.hbm_to_vmem [thread:$0]  %s476_s2, 16, %s34_s27, [#allocation6]  }
  0x22   :  { %372 = dma.done.wait [#allocation4], 128  }
  0x23   :  { %373 = vsyncadd [#allocation4], 4294967168 }
  0x24   :  { %374 = dma.done.wait [#allocation6], 16  }
  0x25   :  { %375 = vsyncadd [#allocation6], 4294967280  ;;  %v378_v0 = vmov 0.0   ;;  %vm379_vm0 = vmmov 0   ;;  %v318_v1 = vld [vmem:[%s475_s1] sm:$0xff]   ;;  %v319_v2 = vld [vmem:[%s475_s1 + $0x8] sm:$0xff]   ;;  %v200_v27 = vstv %s480_s6 }
  0x26   :  { %290 = vmatprep.subr.bf16.mxu0 %v378_v0  ;;  %294 = vmatprep.mubr.msk.bf16.mxu0 %vm379_vm0, %v378_v0  ;;  %v52_v3 = vld [vmem:[#allocation3] sm:$0xff]  ;;  %vm77_vm1 = vcmask 261120   ;;  %v321_v6 = vld [vmem:[%s477_s3 + $0x8] sm:$0xff]   ;;  %vm262_vm4 = vcmask 7168  }
  0x27   :  { %298 = vmatprep.subr.bf16.mxu1 %v378_v0  ;;  %302 = vmatprep.mubr.msk.bf16.mxu1 %vm379_vm0, %v378_v0  ;;  %v53_v4 = vpack.c.bf16 %v52_v3, %v52_v3  ;;  %v320_v5 = vld [vmem:[%s477_s3] sm:$0xff]   ;;  %v270_v7 = vld [vmem:[#allocation5] ss:$0 sm:$0xff] }
  0x28   :  { %291 = vmatpush3.bf16.msra.mxu0 %v318_v1  ;;  %299 = vmatpush3.bf16.msra.mxu1 %v320_v5  ;;  %v322_v16 = vld [vmem:[%s479_s5] sm:$0xff]   ;;  %v323_v17 = vld [vmem:[%s479_s5 + $0x8] sm:$0xff]  }
  0x29   :  { %292 = vmatprep.subr.bf16.mxu0 %v378_v0  ;;  %300 = vmatprep.subr.bf16.mxu1 %v378_v0  ;;  %v274_v18 = vld [vmem:[%s478_s4] ss:$0 sm:$0xff] }
  0x2c   :  { %293 = vmatpush3.bf16.msra.mxu0 %v319_v2  ;;  %301 = vmatpush3.bf16.msra.mxu1 %v321_v6 }
  0x2d   :  { %306 = vmatprep.subr.bf16.mxu0 %v378_v0 }
  0x2f   :  { %295 = vmatmul.mubr.msk.bf16.vlgmr.msra.gmra.mrb[0].mxu0 %vm77_vm1, %v53_v4 }
  0x30   :  { %310 = vmatprep.mubr.msk.bf16.mxu0 %vm379_vm0, %v378_v0  ;;  %307 = vmatpush3.bf16.msra.mxu0 %v322_v16 }
  0x31   :  { %308 = vmatprep.subr.bf16.mxu0 %v378_v0 }
  0x34   :  { %309 = vmatpush3.bf16.msra.mxu0 %v323_v17 }
 0x102   :  { %v115_v8 = vpop.f32.mrb[0].mxu0 }
 0x103   :  { %v116_v9 = vadd.f32 %v270_v7, %v115_v8  ;;  %v296_v10 = vpop.f32.mrb[1].mxu0 }
 0x104   :  { %v118_v11 = vpop.f32.mrb[2].mxu0 }
 0x105   :  { %vm121_vm2 = vcmp.gt.f32.partialorder %v116_v9, 0.0  ;;  %v122_v12 = vmul.f32 0.01, %v116_v9  ;;  %v297_v13 = vpop.f32.mrb[3].mxu0 }
 0x107   :  { %v123_v14 = vsel %vm121_vm2, %v116_v9, %v122_v12 }
 0x108   :  { %v124_v15 = vpack.c.bf16 %v123_v14, %v123_v14 }
 0x10a   :  { %303 = vmatmul.mubr.msk.bf16.vlgmr.msra.gmra.mrb[0].mxu1 %vm77_vm1, %v124_v15 }
 0x1dd   :  { %v185_v19 = vpop.f32.mrb[0].mxu1 }
 0x1de   :  { %v186_v20 = vadd.f32 %v274_v18, %v185_v19  ;;  %v304_v21 = vpop.f32.mrb[1].mxu1 }
 0x1df   :  { %v188_v22 = vpop.f32.mrb[2].mxu1 }
 0x1e0   :  { %vm191_vm3 = vcmp.gt.f32.partialorder %v186_v20, 0.0  ;;  %v192_v23 = vmul.f32 0.01, %v186_v20  ;;  %v305_v24 = vpop.f32.mrb[3].mxu1 }
 0x1e2   :  { %v193_v25 = vsel %vm191_vm3, %v186_v20, %v192_v23 }
 0x1e3   :  { %v194_v26 = vpack.c.bf16 %v193_v25, %v193_v25 }
 0x1e5   :  { %311 = vmatmul.mubr.msk.bf16.vlgmr.msra.gmra.mrb[4].mxu0 %vm77_vm1, %v194_v26 }
 0x2b8   :  { %v250_v28 = vpop.f32.mrb[4].mxu0 }
 0x2b9   :  { %v251_v29 = vadd.f32 %v250_v28, %v200_v27  ;;  %v312_v30 = vpop.f32.mrb[5].mxu0 }
 0x2ba   :  { %v253_v31 = vpop.f32.mrb[6].mxu0 }
 0x2bb   :  { %v256_v32 = vsub.f32 0.0, %v251_v29  ;;  %v313_v33 = vpop.f32.mrb[7].mxu0 }
 0x2bd   :  { %v257_v34 = vmul.f32 1.442695, %v256_v32 }
 0x2bf   :  { %324 = vpow2.f32 %v257_v34 }
 0x2c9   :  { %v325_v35 = vpop.eup %324 }
 0x2ca   :  { %v259_v36 = vadd.f32 1.0, %v325_v35 }
 0x2cc   :  { %326 = vrcp.f32 %v259_v36 }
 0x2d6   :  { %v327_v37 = vpop.eup %326 }
 0x2d7   :  { %263 = vst.msk [vmem:[%s481_s7] sm:$0xff] %vm262_vm4, %v327_v37 }
 0x2d8   :  { %268 = vsyncpa [#allocation4], 1 }
 0x2d9   :  { %269 = vsyncpa [#allocation6], 1 }

</bundles_post_ra>
